<compile_context>
chip_gen: v7x
topology: tpu7x:2x2x1
jax: 0.10.0
libtpu: 0.0.40
codegen_flags: <defaults>
</compile_context>

<pallas_src>
import math

import jax
import jax.numpy as jnp
from jax import lax
from jax.experimental import pallas as pl
from jax.experimental.pallas import tpu as pltpu

# ConvTranspose2d hyperparameters (from the PyTorch module)
KH, KW = 11, 16          # kernel size
SH, SW = 6, 1            # stride
PH, PW = 0, 0            # padding
OPH, OPW = 5, 0          # output_padding

assert SH < KH <= 2 * SH          # each output row touches at most 2 kh taps
assert SW == 1 and PH == 0 and PW == 0

# Max rows per grid step: keeps the double-buffered f32 output block ~1 MiB.
_TILE_M_MAX = 1024


def _deconv_mm_kernel(x_ref, w_ref, o_ref):
    # x_ref: (tile_m, k_pad)   VMEM  rows=(batch,q); cols=[x[q] | x[q-1] | 1 | 0-pad]
    # w_ref: (k_pad, c_pad)    VMEM  banded per-phase weights + bias row (resident)
    # o_ref: (tile_m, c_pad)   VMEM  lane-dense output block (c_pad % 128 == 0)
    # DEFAULT precision: single bf16 MXU pass with f32 accumulation (perf review).
    o_ref[...] = jnp.dot(
        x_ref[...], w_ref[...], preferred_element_type=jnp.float32)


def _build_phase_band_weights(weight, w_in):
    """(1,1,KH,KW) deconv weight -> (2*w_in, SH*w_out) banded matmul operand."""
    w = weight[0, 0].astype(jnp.float32)                    # (KH, KW)
    w_out = (w_in - 1) * SW + KW + OPW                      # = w_in + KW - 1
    iw = jnp.arange(w_in)[:, None]
    ow = jnp.arange(w_out)[None, :]
    d = ow - iw                                             # kw index = ow - iw
    valid = (d >= 0) & (d < KW)
    # band[kh, iw, ow] = w[kh, ow - iw] where valid, else 0
    band = jnp.where(valid[None, :, :], w[:, jnp.clip(d, 0, KW - 1)], 0.0)
    n_missing = 2 * SH - KH                                 # phases with 1 tap only
    band_a = band[:SH]                                      # kh = p        (6,Win,Wout)
    band_b = jnp.concatenate(
        [band[SH:KH], jnp.zeros((n_missing, w_in, w_out), jnp.float32)], axis=0)
    wa = jnp.transpose(band_a, (1, 0, 2)).reshape(w_in, SH * w_out)
    wb = jnp.transpose(band_b, (1, 0, 2)).reshape(w_in, SH * w_out)
    return jnp.concatenate([wa, wb], axis=0)                # (2*w_in, SH*w_out)


@jax.jit
def deconv2d_transpose(x, weight, bias):
    """x: (N,1,H,W) f32; weight: (1,1,KH,KW) f32 (PyTorch I,O,kH,kW); bias: (1,)."""
    n, c, h_in, w_in = x.shape
    assert c == 1
    h_out = (h_in - 1) * SH - 2 * PH + KH + OPH
    w_out = (w_in - 1) * SW - 2 * PW + KW + OPW

    # --- phase-decomposition operands (all fused into this jit) ---
    # out[n, SH*q + p, :] = x[n, q, :] @ B_p + x[n, q-1, :] @ B_{p+SH} + b
    n_q = h_in + 2                      # q = 0 .. h_in+1 covers every output row
    xs = x[:, 0].astype(jnp.float32)                          # (N, H, W)
    xa = jnp.pad(xs, ((0, 0), (0, 2), (0, 0)))                # x[q]   (0 for q >= H)
    xb = jnp.pad(xs, ((0, 0), (1, 1), (0, 0)))                # x[q-1] (0 for q == 0)
    x_cat = jnp.concatenate([xa, xb], axis=-1)                # (N, n_q, 2W)
    rows = n * n_q
    x_cat = x_cat.reshape(rows, 2 * w_in)

    # Fold bias into the matmul: ones column on x, bias row on w.
    k = 2 * w_in + 1
    k_pad = 8 * math.ceil(k / 8)
    x_cat = jnp.concatenate([x_cat, jnp.ones((rows, 1), jnp.float32)], axis=-1)
    x_cat = jnp.pad(x_cat, ((0, 0), (0, k_pad - k)))

    cols = SH * w_out
    cols_pad = 128 * math.ceil(cols / 128)                    # lane-dense stores
    w_band = _build_phase_band_weights(weight, w_in)          # (2W, cols)
    bias_row = jnp.broadcast_to(
        bias.astype(jnp.float32).reshape(1, 1), (1, cols))
    w_cat = jnp.concatenate([w_band, bias_row], axis=0)       # (k, cols)
    w_cat = jnp.pad(w_cat, ((0, k_pad - k), (0, cols_pad - cols)))

    # Row-tiled parallel grid (double-buffered pipelining; megacore on v7x).
    tile_m = min(_TILE_M_MAX, 8 * math.ceil(rows / 8))
    rows_pad = tile_m * math.ceil(rows / tile_m)
    x_cat = jnp.pad(x_cat, ((0, rows_pad - rows), (0, 0)))
    grid = (rows_pad // tile_m,)

    # VMEM budget: double-buffered x / w / out blocks + headroom (v7x: 64 MiB).
    vmem_bytes = 4 * 2 * (tile_m * k_pad + k_pad * cols_pad + tile_m * cols_pad)
    vmem_limit = int(min(max(2 * vmem_bytes, 16 << 20), 64 << 20))

    out_flat = pl.pallas_call(
        _deconv_mm_kernel,
        out_shape=jax.ShapeDtypeStruct((rows_pad, cols_pad), jnp.float32),
        grid=grid,
        in_specs=[
            pl.BlockSpec((tile_m, k_pad), lambda i: (i, 0)),       # row tile
            pl.BlockSpec((k_pad, cols_pad), lambda i: (0, 0)),     # resident weights
        ],
        out_specs=pl.BlockSpec((tile_m, cols_pad), lambda i: (i, 0)),
        compiler_params=pltpu.CompilerParams(
            dimension_semantics=("parallel",),
            vmem_limit_bytes=vmem_limit,
        ),
    )(x_cat, w_cat)

    # Slice away the lane/sublane padding and un-flatten the phases.
    out = out_flat[:rows, :cols].reshape(n, n_q, SH, w_out)
    out = out.reshape(n, n_q * SH, w_out)[:, :h_out, :]
    return out[:, None, :, :]                                 # back to NCHW


def ref_deconv(x, weight, bias):
    """Pure-JAX reference via lhs-dilated convolution (full f32 precision)."""
    w_flip = weight[:, :, ::-1, ::-1]                         # (I,O,KH,KW) flipped
    w_oihw = jnp.transpose(w_flip, (1, 0, 2, 3))              # (O,I,KH,KW)
    out = lax.conv_general_dilated(
        x, w_oihw,
        window_strides=(1, 1),
        padding=((KH - 1 - PH, KH - 1 - PH + OPH),
                 (KW - 1 - PW, KW - 1 - PW + OPW)),
        lhs_dilation=(SH, SW),
        rhs_dilation=(1, 1),
        dimension_numbers=("NCHW", "OIHW", "NCHW"),
        precision=lax.Precision.HIGHEST,
    )
    return out + bias[None, :, None, None]


if __name__ == "__main__":
    key = jax.random.PRNGKey(0)
    k1, k2, k3 = jax.random.split(key, 3)

    N, C, H, W = 2, 1, 8, 16
    x = jax.random.normal(k1, (N, C, H, W), jnp.float32)

    # Deterministic parameter init (PyTorch-style uniform bound 1/sqrt(fan)).
    fan = C * KH * KW
    bound = 1.0 / (fan ** 0.5)
    weight = jax.random.uniform(k2, (1, 1, KH, KW), jnp.float32, -bound, bound)
    bias = jax.random.uniform(k3, (1,), jnp.float32, -bound, bound)

    out = deconv2d_transpose(x, weight, bias)
    out = jax.block_until_ready(out)

    expected_shape = (N, 1, (H - 1) * SH + KH + OPH, (W - 1) * SW + KW + OPW)
    assert out.shape == expected_shape, (out.shape, expected_shape)

    ref = ref_deconv(x, weight, bias)
    # DEFAULT-precision MXU pass (bf16 operands, f32 accumulation): expected
    # abs error ~1e-3 for K~=33 with O(1) operands.  Use HIGHEST in the kernel
    # if tighter accuracy is required.
    err = float(jnp.max(jnp.abs(out - ref)))
    assert jnp.allclose(out, ref, atol=1e-2, rtol=1e-2), err

    print("KERNEL_OK")
</pallas_src>

<mosaic_0001>
module attributes {stable_mosaic.version = 11 : i64} {
  func.func @_deconv_mm_kernel(%arg0: i32, %arg1: memref<24x40xf32, #tpu.memory_space<vmem>>, %arg2: memref<40x256xf32, #tpu.memory_space<vmem>>, %arg3: memref<24x256xf32, #tpu.memory_space<vmem>>) attributes {dimension_semantics = [#tpu.dimension_semantics<parallel>], iteration_bounds = array<i64: 1>, scalar_prefetch = 0 : i64, scratch_operands = 0 : i64, tpu.core_type = #tpu.core_type<tc>, window_params = [{transform_indices = @transform_0, window_bounds = array<i64: 24, 40>}, {pipeline_mode = #tpu.pipeline_mode<synchronous>, transform_indices = @transform_1, window_bounds = array<i64: 40, 256>}, {transform_indices = @transform_2, window_bounds = array<i64: 24, 256>}]} {
    %c0 = arith.constant 0 : index
    %c0_0 = arith.constant 0 : index
    %0 = vector.load %arg1[%c0, %c0_0] : memref<24x40xf32, #tpu.memory_space<vmem>>, vector<24x40xf32>
    %c0_1 = arith.constant 0 : index
    %c0_2 = arith.constant 0 : index
    %1 = vector.load %arg2[%c0_1, %c0_2] : memref<40x256xf32, #tpu.memory_space<vmem>>, vector<40x256xf32>
    %cst = arith.constant dense<0.000000e+00> : vector<24x256xf32>
    %2 = tpu.matmul %0, %1, %cst {dimension_numbers = #tpu.dot_dimension_numbers<[1], [0], [0], [1], [0, 0, 1, 1], [], []>} : vector<24x40xf32>, vector<40x256xf32>, vector<24x256xf32> -> vector<24x256xf32>
    %c0_3 = arith.constant 0 : index
    %c0_4 = arith.constant 0 : index
    %3 = vector.load %arg3[%c0_3, %c0_4] : memref<24x256xf32, #tpu.memory_space<vmem>>, vector<24x256xf32>
    tpu.vector_store %arg3[%c0_3, %c0_4], %2 {strides = array<i32>} : memref<24x256xf32, #tpu.memory_space<vmem>>, vector<24x256xf32>,
    return
  }
  func.func @transform_0(%arg0: i32) -> (i32, i32) {
    %c0_i32 = arith.constant 0 : i32
    %c0_i32_0 = arith.constant 0 : i32
    return %arg0, %c0_i32 : i32, i32
  }
  func.func @transform_1(%arg0: i32) -> (i32, i32) {
    %c0_i32 = arith.constant 0 : i32
    %c0_i32_0 = arith.constant 0 : i32
    %c0_i32_1 = arith.constant 0 : i32
    return %c0_i32, %c0_i32_0 : i32, i32
  }
  func.func @transform_2(%arg0: i32) -> (i32, i32) {
    %c0_i32 = arith.constant 0 : i32
    %c0_i32_0 = arith.constant 0 : i32
    return %arg0, %c0_i32 : i32, i32
  }
}

</mosaic_0001>

<bundles_post_ra>
// kernel: deconv2d_transpose.1
= control target key start
LH: loop header
LB: loop body
LE: loop exit
PB: predicated region body
PF: predicated region fallthrough
CT: control target
= control target key end

     0   :  { %v145_v3 = vmov 0.0   ;;  %vm24_vm0 = vcmask 326656   ;;  %s218_s1 = inlined_call_operand.vmem [shape: f32[40,256], index: 1, kind: input, shape index: {}]   ;;  %s219_s0 = inlined_call_operand.vmem [shape: f32[24,40], index: 0, kind: input, shape index: {}]   ;;  %s220_s2 = inlined_call_operand.vmem [shape: f32[24,256], index: 2, kind: output, shape index: {}]  }
   0x1   :  { %v15_v0 = vld [vmem:[%s218_s1 + $0x8] sm:$0xff]  ;;  %v17_v1 = vld [vmem:[%s218_s1 + $0x18] sm:$0xff]  ;;  %v14_v2 = vld [vmem:[%s218_s1] sm:$0xff]  ;;  %104 = vmatprep.mubr.f32.mxu1 %v145_v3  ;;  %98 = vmatprep.mubr.f32.mxu0 %v145_v3 }
   0x2   :  { %v130_v4 = vpack.c.bf16 %v17_v1, %v15_v0  ;;  %v16_v5 = vld [vmem:[%s218_s1 + $0x10] sm:$0xff]  ;;  %v19_v6 = vld [vmem:[%s218_s1 + $0x28] sm:$0xff]  ;;  %v21_v7 = vld [vmem:[%s218_s1 + $0x38] sm:$0xff] }
   0x3   :  { %v132_v8 = vpack.c.bf16 %v16_v5, %v14_v2  ;;  %v134_v9 = vpack.c.bf16 %v21_v7, %v19_v6  ;;  %v18_v10 = vld [vmem:[%s218_s1 + $0x20] sm:$0xff]  ;;  %v20_v11 = vld [vmem:[%s218_s1 + $0x30] sm:$0xff]  ;;  %v23_v13 = vld [vmem:[%s218_s1 + $0x48] sm:$0xff] }
   0x4   :  { %138 = vmatprep.subr.bf16.mxu1 %v130_v4  ;;  %131 = vmatprep.subr.bf16.mxu0 %v130_v4  ;;  %v136_v12 = vpack.c.bf16 %v20_v11, %v18_v10  ;;  %v22_v14 = vld [vmem:[%s218_s1 + $0x40] sm:$0xff]  ;;  %v12_v15 = vld [vmem:[%s219_s0 + $0x8] sm:$0xff]  ;;  %v13_v17 = vld [vmem:[%s219_s0 + $0x10] sm:$0xff] }
   0x5   :  { %141 = vmatpush1.bf16.msra.mxu1 %v132_v8  ;;  %133 = vmatpush1.bf16.msra.mxu0 %v132_v8  ;;  %v11_v16 = vld [vmem:[%s219_s0] sm:$0xff] }
   0x6   :  { %139 = vmatprep.subr.bf16.mxu1 %v134_v9  ;;  %135 = vmatprep.subr.bf16.mxu0 %v134_v9 }
   0x9   :  { %142 = vmatpush1.bf16.msra.mxu1 %v136_v12  ;;  %137 = vmatpush1.bf16.msra.mxu0 %v136_v12 }
   0xa   :  { %140 = vmatprep.subr.mxu1 %v23_v13  ;;  %42 = vmatprep.subr.mxu0 %v23_v13 }
   0xd   :  { %143 = vmatpush1.msra.mxu1 %v22_v14  ;;  %43 = vmatpush1.msra.mxu0 %v22_v14 }
   0xe   :  { %128 = vmatmul.mubr.msk.f32.vlgmr.msra.gmra.mrb[0].mxu1 %vm24_vm0, %v12_v15  ;;  %127 = vmatmul.mubr.msk.f32.vlgmr.msra.gmra.mrb[0].mxu0 %vm24_vm0, %v11_v16 }
   0xf   :  { %110 = vmatprep.mubr.f32.mxu1 %v145_v3 }
  0x12   :  { %129 = vmatmul.mubr.msk.f32.gmra.mrb[2].mxu1 %vm24_vm0, %v13_v17 }
  0xe1   :  { %v106_v18 = vpop.f32.mrb[0].mxu1  ;;  %v100_v19 = vpop.f32.mrb[0].mxu0 }
  0xe2   :  { %119 = vst [vmem:[%s220_s2 + $0x10] sm:$0xff] %v106_v18  ;;  %v108_v20 = vpop.f32.mrb[1].mxu1  ;;  %117 = vst [vmem:[%s220_s2] sm:$0xff] %v100_v19  ;;  %v102_v21 = vpop.f32.mrb[1].mxu0 }
  0xe3   :  { %120 = vst [vmem:[%s220_s2 + $0x18] sm:$0xff] %v108_v20  ;;  %118 = vst [vmem:[%s220_s2 + $0x8] sm:$0xff] %v102_v21 }
  0xe5   :  { %v112_v22 = vpop.f32.mrb[2].mxu1 }
  0xe6   :  { %121 = vst [vmem:[%s220_s2 + $0x20] sm:$0xff] %v112_v22  ;;  %v114_v23 = vpop.f32.mrb[3].mxu1 }
  0xe7   :  { %122 = vst [vmem:[%s220_s2 + $0x28] sm:$0xff] %v114_v23 }

</bundles_post_ra>
